<compile_context>
chip_gen: v7x
topology: tpu7x:2x2x1
jax: 0.10.0
libtpu: 0.0.40
codegen_flags: <defaults>
</compile_context>

<pallas_src>
import functools

import jax
import jax.numpy as jnp
from jax.experimental import pallas as pl
from jax.experimental.pallas import tpu as pltpu


# ---------------------------------------------------------------------------
# Kernels
# ---------------------------------------------------------------------------
def _revin_norm_kernel(x_ref, w_ref, b_ref, y_ref, stats_ref, *, eps, time_axis):
    x = x_ref[...]                                       # (bb, T, C) or (bb, C, T)
    x32 = x.astype(jnp.float32)

    # Two-pass, numerically safe stats (population variance, unbiased=False).
    mean = jnp.mean(x32, axis=time_axis, keepdims=True)
    var = jnp.mean((x32 - mean) ** 2, axis=time_axis, keepdims=True)
    std = jnp.sqrt(var + eps)
    inv_std = 1.0 / std                                  # exact; O(bb*C) only

    w = w_ref[...]                                       # (1,1,C) or (1,C,1) f32
    b = b_ref[...]
    scale = inv_std * w                                  # per-(b, c)
    shift = b - mean * scale

    if x.dtype == jnp.float32:
        y = x32 * scale + shift                          # single fused mul+add
    else:
        # bf16 path: keep the streaming elementwise work in the native dtype.
        y = x * scale.astype(x.dtype) + shift.astype(x.dtype)
    y_ref[...] = y.astype(y_ref.dtype)

    # One fused stats store: [mean; std] stacked along the reduced axis.
    stats_ref[...] = jnp.concatenate([mean, std], axis=time_axis).astype(
        stats_ref.dtype
    )


def _revin_denorm_kernel(x_ref, scale_ref, shift_ref, y_ref):
    x = x_ref[...]                                       # (bb, tt, C) or (bb, C, tt)
    scale = scale_ref[...]                               # per-(b, c), f32
    shift = shift_ref[...]
    if x.dtype == jnp.float32:
        y = x * scale + shift
    else:
        y = x * scale.astype(x.dtype) + shift.astype(x.dtype)
    y_ref[...] = y.astype(y_ref.dtype)


# ---------------------------------------------------------------------------
# Padding-aware tiling / VMEM accounting
# ---------------------------------------------------------------------------
_LANE = 128


def _cdiv(a, b):
    return -(-a // b)


def _round_up(x, m):
    return _cdiv(x, m) * m


def _sublane_granule(itemsize):
    return {4: 8, 2: 16, 1: 32}.get(int(itemsize), 8)


def _tile_bytes(rows, cols, itemsize):
    return (
        _round_up(max(rows, 1), _sublane_granule(itemsize))
        * _round_up(max(cols, 1), _LANE)
        * int(itemsize)
    )


def _instance_bytes(t, c, itemsize, time_axis):
    """Padded VMEM bytes for one (batch) instance, all buffers counted."""
    rows, cols = (t, c) if time_axis == 1 else (c, t)
    io = _tile_bytes(rows, cols, itemsize)
    f32 = _tile_bytes(rows, cols, 4)
    # 2x double-buffered input + 2x double-buffered output + ~2 f32 temps.
    return 2 * io + 2 * io + 2 * f32


@functools.lru_cache(maxsize=None)
def _vmem_limit_bytes():
    phys = 64 * 1024 * 1024            # conservative fallback (v7x-sized)
    try:
        phys = int(pltpu.get_tpu_info().vmem_capacity_bytes)
    except Exception:
        pass
    # v5e/v6e (128 MiB physical) -> 64 MiB limit; v7x (64 MiB) -> 48 MiB.
    return min(phys * 3 // 4, 64 * 1024 * 1024)


def _block_budget_bytes():
    return _vmem_limit_bytes() // 2     # headroom for stats/params/internal scratch


def _compiler_params(num_grid_axes):
    return pltpu.CompilerParams(
        dimension_semantics=("parallel",) * num_grid_axes,
        vmem_limit_bytes=_vmem_limit_bytes(),
    )


def _pick_batch_block(B, T, C, itemsize, time_axis, budget):
    per_inst = _instance_bytes(T, C, itemsize, time_axis)
    bb = max(1, budget // per_inst)
    bb = min(bb, B)
    # >= ~4 grid steps when B permits: enables pipelining and keeps both v7x
    # TensorCores busy via the "parallel" batch axis.
    bb = min(bb, max(1, _cdiv(B, 4)))
    # Even-ish blocks without a divisor hunt; cdiv grid masks the partial block.
    bb = _cdiv(B, _cdiv(B, bb))
    return bb


def _pick_denorm_blocks(B, T, C, itemsize, time_axis, budget):
    t_gran = _sublane_granule(itemsize) if time_axis == 1 else _LANE
    tt = T
    # Shrink the time tile until a single-instance block fits the budget.
    while tt > t_gran and _instance_bytes(tt, C, itemsize, time_axis) > budget:
        tt = max(t_gran, _round_up(tt // 2, t_gran))
    bb = max(1, budget // _instance_bytes(tt, C, itemsize, time_axis))
    bb = min(bb, B)
    bb = min(bb, max(1, _cdiv(B, 4)))
    bb = _cdiv(B, _cdiv(B, bb))
    nb = _cdiv(B, bb)
    nt = _cdiv(T, tt)
    # v7x: make sure there are >= 2 parallel steps even when B == 1.
    if nb * nt < 2 and T >= 2 * t_gran:
        tt = _round_up(_cdiv(T, 2), t_gran)
        nt = _cdiv(T, tt)
    return bb, tt, nb, nt


# ---------------------------------------------------------------------------
# Wrappers
# ---------------------------------------------------------------------------
def revin_norm(x, affine_weight, affine_bias, eps=1e-5, layout="btc"):
    """mode='norm': returns (normalized_x, mean, stdev).

    layout="btc": x is (B, T, C) (PyTorch RevIN layout).
    layout="bct": x is (B, C, T) channel-major — lane-dense when C < 128; use it
    when the producer can supply channel-major data.
    """
    if layout not in ("btc", "bct"):
        raise ValueError(f"unknown layout {layout!r}")
    if x.ndim != 3:
        raise ValueError("expected a 3-D input")
    time_axis = 1 if layout == "btc" else 2
    B = x.shape[0]
    if layout == "btc":
        T, C = x.shape[1], x.shape[2]
    else:
        C, T = x.shape[1], x.shape[2]

    bb = _pick_batch_block(B, T, C, x.dtype.itemsize, time_axis, _block_budget_bytes())
    nb = _cdiv(B, bb)

    if layout == "btc":
        w3 = affine_weight.reshape(1, 1, C).astype(jnp.float32)
        b3 = affine_bias.reshape(1, 1, C).astype(jnp.float32)
        x_block = (bb, T, C)
        wb_block = (1, 1, C)
        stats_shape = (B, 2, C)
        stats_block = (bb, 2, C)
    else:
        w3 = affine_weight.reshape(1, C, 1).astype(jnp.float32)
        b3 = affine_bias.reshape(1, C, 1).astype(jnp.float32)
        x_block = (bb, C, T)
        wb_block = (1, C, 1)
        stats_shape = (B, C, 2)
        stats_block = (bb, C, 2)

    kernel = functools.partial(
        _revin_norm_kernel, eps=float(eps), time_axis=time_axis
    )
    y, stats = pl.pallas_call(
        kernel,
        out_shape=(
            jax.ShapeDtypeStruct(x.shape, x.dtype),
            jax.ShapeDtypeStruct(stats_shape, jnp.float32),
        ),
        grid_spec=pltpu.PrefetchScalarGridSpec(
            num_scalar_prefetch=0,
            grid=(nb,),
            in_specs=[
                pl.BlockSpec(x_block, lambda i: (i, 0, 0)),
                pl.BlockSpec(wb_block, lambda i: (0, 0, 0)),
                pl.BlockSpec(wb_block, lambda i: (0, 0, 0)),
            ],
            out_specs=[
                pl.BlockSpec(x_block, lambda i: (i, 0, 0)),
                pl.BlockSpec(stats_block, lambda i: (i, 0, 0)),
            ],
        ),
        compiler_params=_compiler_params(1),
    )(x, w3, b3)

    if layout == "btc":
        mean, std = stats[:, 0:1, :], stats[:, 1:2, :]     # (B, 1, C)
    else:
        mean, std = stats[:, :, 0:1], stats[:, :, 1:2]     # (B, C, 1)
    return y, mean, std


def revin_denorm(x, mean, std, affine_weight, affine_bias, eps=1e-5, layout="btc"):
    """mode='denorm': uses the stats produced by revin_norm (same layout)."""
    if layout not in ("btc", "bct"):
        raise ValueError(f"unknown layout {layout!r}")
    time_axis = 1 if layout == "btc" else 2
    B = x.shape[0]
    if layout == "btc":
        T, C = x.shape[1], x.shape[2]
        w3 = affine_weight.reshape(1, 1, C).astype(jnp.float32)
        b3 = affine_bias.reshape(1, 1, C).astype(jnp.float32)
    else:
        C, T = x.shape[1], x.shape[2]
        w3 = affine_weight.reshape(1, C, 1).astype(jnp.float32)
        b3 = affine_bias.reshape(1, C, 1).astype(jnp.float32)

    # Fold stats + affine into per-(batch, channel) scale/shift (O(B*C) XLA):
    #   (x - b) / (w + eps) * std + mean  ==  x * scale + shift
    scale = std.astype(jnp.float32) / (w3 + eps)
    shift = mean.astype(jnp.float32) - b3 * scale

    bb, tt, nb, nt = _pick_denorm_blocks(
        B, T, C, x.dtype.itemsize, time_axis, _block_budget_bytes()
    )

    if layout == "btc":
        x_block = (bb, tt, C)
        x_map = lambda i, j: (i, j, 0)
        ss_block = (bb, 1, C)
    else:
        x_block = (bb, C, tt)
        x_map = lambda i, j: (i, 0, j)
        ss_block = (bb, C, 1)
    ss_map = lambda i, j: (i, 0, 0)       # invariant along the time-tile axis

    y = pl.pallas_call(
        _revin_denorm_kernel,
        out_shape=jax.ShapeDtypeStruct(x.shape, x.dtype),
        grid_spec=pltpu.PrefetchScalarGridSpec(
            num_scalar_prefetch=0,
            grid=(nb, nt),
            in_specs=[
                pl.BlockSpec(x_block, x_map),
                pl.BlockSpec(ss_block, ss_map),
                pl.BlockSpec(ss_block, ss_map),
            ],
            out_specs=pl.BlockSpec(x_block, x_map),
        ),
        compiler_params=_compiler_params(2),
    )(x, scale, shift)
    return y


# ---------------------------------------------------------------------------
# Pure-JAX references (mirror the PyTorch module, (B, T, C) layout)
# ---------------------------------------------------------------------------
def _ref_norm(x, w, b, eps):
    mean = jnp.mean(x, axis=1, keepdims=True)
    var = jnp.var(x, axis=1, keepdims=True)               # ddof=0 (unbiased=False)
    std = jnp.sqrt(var + eps)
    return ((x - mean) / std) * w + b, mean, std


def _ref_denorm(x, mean, std, w, b, eps):
    return ((x - b) / (w + eps)) * std + mean


if __name__ == "__main__":
    key = jax.random.PRNGKey(0)
    B, T, C = 2, 8, 4          # batch=2, seq=8, num_features=4
    eps = 1e-5

    x = jax.random.normal(key, (B, T, C), dtype=jnp.float32) * 3.0 + 1.5

    # Affine parameters (RevIN inits ones/zeros; use non-trivial values to
    # exercise the affine path).
    affine_weight = jnp.linspace(0.5, 1.5, C).astype(jnp.float32)
    affine_bias = jnp.linspace(-0.2, 0.3, C).astype(jnp.float32)

    # --- default (B, T, C) layout, matching the PyTorch module -------------
    y, mean, std = revin_norm(x, affine_weight, affine_bias, eps)
    x_rec = revin_denorm(y, mean, std, affine_weight, affine_bias, eps)
    jax.block_until_ready((y, mean, std, x_rec))

    y_ref, mean_ref, std_ref = _ref_norm(x, affine_weight, affine_bias, eps)
    x_rec_ref = _ref_denorm(y_ref, mean_ref, std_ref, affine_weight, affine_bias, eps)

    assert jnp.allclose(y, y_ref, atol=1e-5, rtol=1e-5)
    assert jnp.allclose(mean, mean_ref, atol=1e-5, rtol=1e-5)
    assert jnp.allclose(std, std_ref, atol=1e-5, rtol=1e-5)
    assert jnp.allclose(x_rec, x_rec_ref, atol=1e-5, rtol=1e-5)
    assert jnp.allclose(x_rec, x, atol=1e-4, rtol=1e-4)

    # --- channel-major (B, C, T) lane-dense path ----------------------------
    x_bct = jnp.swapaxes(x, 1, 2)
    y2, mean2, std2 = revin_norm(x_bct, affine_weight, affine_bias, eps, layout="bct")
    x_rec2 = revin_denorm(y2, mean2, std2, affine_weight, affine_bias, eps, layout="bct")
    jax.block_until_ready((y2, x_rec2))

    assert jnp.allclose(jnp.swapaxes(y2, 1, 2), y_ref, atol=1e-5, rtol=1e-5)
    assert jnp.allclose(jnp.swapaxes(mean2, 1, 2), mean_ref, atol=1e-5, rtol=1e-5)
    assert jnp.allclose(jnp.swapaxes(std2, 1, 2), std_ref, atol=1e-5, rtol=1e-5)
    assert jnp.allclose(jnp.swapaxes(x_rec2, 1, 2), x, atol=1e-4, rtol=1e-4)

    print("KERNEL_OK")
</pallas_src>

<mosaic_0001>
module attributes {stable_mosaic.version = 11 : i64} {
  func.func @_revin_norm_kernel(%arg0: i32, %arg1: memref<1x8x4xf32, #tpu.memory_space<vmem>>, %arg2: memref<1x1x4xf32, #tpu.memory_space<vmem>>, %arg3: memref<1x1x4xf32, #tpu.memory_space<vmem>>, %arg4: memref<1x8x4xf32, #tpu.memory_space<vmem>>, %arg5: memref<1x2x4xf32, #tpu.memory_space<vmem>>) attributes {dimension_semantics = [#tpu.dimension_semantics<parallel>], iteration_bounds = array<i64: 2>, scalar_prefetch = 0 : i64, scratch_operands = 0 : i64, tpu.core_type = #tpu.core_type<tc>, window_params = [{transform_indices = @transform_0, window_bounds = array<i64: 1, 8, 4>}, {pipeline_mode = #tpu.pipeline_mode<synchronous>, transform_indices = @transform_1, window_bounds = array<i64: 1, 1, 4>}, {pipeline_mode = #tpu.pipeline_mode<synchronous>, transform_indices = @transform_2, window_bounds = array<i64: 1, 1, 4>}, {transform_indices = @transform_3, window_bounds = array<i64: 1, 8, 4>}, {transform_indices = @transform_4, window_bounds = array<i64: 1, 2, 4>}]} {
    %c0 = arith.constant 0 : index
    %c0_0 = arith.constant 0 : index
    %c0_1 = arith.constant 0 : index
    %0 = vector.load %arg1[%c0, %c0_0, %c0_1] : memref<1x8x4xf32, #tpu.memory_space<vmem>>, vector<1x8x4xf32>
    %cst = arith.constant dense<0.000000e+00> : vector<1x4xf32>
    %1 = vector.multi_reduction <add>, %0, %cst [1] : vector<1x8x4xf32> to vector<1x4xf32>
    %2 = vector.shape_cast %1 : vector<1x4xf32> to vector<1x1x4xf32>
    %cst_2 = arith.constant 8.000000e+00 : f32
    %3 = vector.broadcast %cst_2 : f32 to vector<1x1x4xf32>
    %4 = arith.divf %2, %3 : vector<1x1x4xf32>
    %5 = vector.broadcast %4 : vector<1x1x4xf32> to vector<1x8x4xf32>
    %6 = arith.subf %0, %5 : vector<1x8x4xf32>
    %7 = arith.mulf %6, %6 : vector<1x8x4xf32>
    %cst_3 = arith.constant dense<0.000000e+00> : vector<1x4xf32>
    %8 = vector.multi_reduction <add>, %7, %cst_3 [1] : vector<1x8x4xf32> to vector<1x4xf32>
    %9 = vector.shape_cast %8 : vector<1x4xf32> to vector<1x1x4xf32>
    %cst_4 = arith.constant 8.000000e+00 : f32
    %10 = vector.broadcast %cst_4 : f32 to vector<1x1x4xf32>
    %11 = arith.divf %9, %10 : vector<1x1x4xf32>
    %cst_5 = arith.constant 9.99999974E-6 : f32
    %12 = vector.broadcast %cst_5 : f32 to vector<1x1x4xf32>
    %13 = arith.addf %11, %12 : vector<1x1x4xf32>
    %14 = math.sqrt %13 : vector<1x1x4xf32>
    %cst_6 = arith.constant 1.000000e+00 : f32
    %15 = vector.broadcast %cst_6 : f32 to vector<1x1x4xf32>
    %16 = arith.divf %15, %14 : vector<1x1x4xf32>
    %c0_7 = arith.constant 0 : index
    %c0_8 = arith.constant 0 : index
    %c0_9 = arith.constant 0 : index
    %17 = vector.load %arg2[%c0_7, %c0_8, %c0_9] : memref<1x1x4xf32, #tpu.memory_space<vmem>>, vector<1x1x4xf32>
    %c0_10 = arith.constant 0 : index
    %c0_11 = arith.constant 0 : index
    %c0_12 = arith.constant 0 : index
    %18 = vector.load %arg3[%c0_10, %c0_11, %c0_12] : memref<1x1x4xf32, #tpu.memory_space<vmem>>, vector<1x1x4xf32>
    %19 = arith.mulf %16, %17 : vector<1x1x4xf32>
    %20 = arith.mulf %4, %19 : vector<1x1x4xf32>
    %21 = arith.subf %18, %20 : vector<1x1x4xf32>
    %22 = vector.broadcast %19 : vector<1x1x4xf32> to vector<1x8x4xf32>
    %23 = arith.mulf %0, %22 : vector<1x8x4xf32>
    %24 = vector.broadcast %21 : vector<1x1x4xf32> to vector<1x8x4xf32>
    %25 = arith.addf %23, %24 : vector<1x8x4xf32>
    %c0_13 = arith.constant 0 : index
    %c0_14 = arith.constant 0 : index
    %c0_15 = arith.constant 0 : index
    %26 = vector.load %arg4[%c0_13, %c0_14, %c0_15] : memref<1x8x4xf32, #tpu.memory_space<vmem>>, vector<1x8x4xf32>
    tpu.vector_store %arg4[%c0_13, %c0_14, %c0_15], %25 {strides = array<i32>} : memref<1x8x4xf32, #tpu.memory_space<vmem>>, vector<1x8x4xf32>,
    %27 = tpu.concatenate %4, %14 in 1 : vector<1x1x4xf32>, vector<1x1x4xf32> -> vector<1x2x4xf32>
    %c0_16 = arith.constant 0 : index
    %c0_17 = arith.constant 0 : index
    %c0_18 = arith.constant 0 : index
    %28 = vector.load %arg5[%c0_16, %c0_17, %c0_18] : memref<1x2x4xf32, #tpu.memory_space<vmem>>, vector<1x2x4xf32>
    tpu.vector_store %arg5[%c0_16, %c0_17, %c0_18], %27 {strides = array<i32>} : memref<1x2x4xf32, #tpu.memory_space<vmem>>, vector<1x2x4xf32>,
    return
  }
  func.func @transform_0(%arg0: i32) -> (i32, i32, i32) {
    %c0_i32 = arith.constant 0 : i32
    %c0_i32_0 = arith.constant 0 : i32
    %c0_i32_1 = arith.constant 0 : i32
    return %arg0, %c0_i32, %c0_i32_0 : i32, i32, i32
  }
  func.func @transform_1(%arg0: i32) -> (i32, i32, i32) {
    %c0_i32 = arith.constant 0 : i32
    %c0_i32_0 = arith.constant 0 : i32
    %c0_i32_1 = arith.constant 0 : i32
    %c0_i32_2 = arith.constant 0 : i32
    return %c0_i32, %c0_i32_0, %c0_i32_1 : i32, i32, i32
  }
  func.func @transform_2(%arg0: i32) -> (i32, i32, i32) {
    %c0_i32 = arith.constant 0 : i32
    %c0_i32_0 = arith.constant 0 : i32
    %c0_i32_1 = arith.constant 0 : i32
    %c0_i32_2 = arith.constant 0 : i32
    return %c0_i32, %c0_i32_0, %c0_i32_1 : i32, i32, i32
  }
  func.func @transform_3(%arg0: i32) -> (i32, i32, i32) {
    %c0_i32 = arith.constant 0 : i32
    %c0_i32_0 = arith.constant 0 : i32
    %c0_i32_1 = arith.constant 0 : i32
    return %arg0, %c0_i32, %c0_i32_0 : i32, i32, i32
  }
  func.func @transform_4(%arg0: i32) -> (i32, i32, i32) {
    %c0_i32 = arith.constant 0 : i32
    %c0_i32_0 = arith.constant 0 : i32
    %c0_i32_1 = arith.constant 0 : i32
    return %arg0, %c0_i32, %c0_i32_0 : i32, i32, i32
  }
}

</mosaic_0001>

<bundles_post_ra>
// kernel: tpu_custom_call.1
= control target key start
LH: loop header
LB: loop body
LE: loop exit
PB: predicated region body
PF: predicated region fallthrough
CT: control target
= control target key end

     0   :  { %10 = vsyncpa [#allocation3], 0  ;;  %s634_s0 = inlined_call_operand.vmem [shape: f32[2,8,4], index: 0, kind: input, shape index: {}]   ;;  %s635_s1 = inlined_call_operand.vmem [shape: f32[1,1,4], index: 1, kind: input, shape index: {}]   ;;  %s636_s2 = inlined_call_operand.vmem [shape: f32[1,1,4], index: 2, kind: input, shape index: {}]   ;;  %s637_s3 = inlined_call_operand.vmem [shape: f32[2,8,4], index: 3, kind: output, shape index: {0}]   ;;  %s638_s4 = inlined_call_operand.hbm [shape: f32[2,2,4], index: 4, kind: output, shape index: {1}]  }
   0x1   :  { %12 = vsyncpa [#allocation3 + $0x1], 0  ;;  %s505_s15 = smov 0   ;;  %s507_s16 = smov 0  }
   0x2   :  { %s509_s17 = smov 0   ;;  %s511_s18 = smov 0  }
   0x3 LB: > { %s526_s19 = sadd.s32 4294967295, %s477_s18   ;;  %s361_s20 = sadd.s32 4294967294, %s477_s18   ;;  %s477_s18 = sphi %s511_s18, %s644_s18   ;;  %s473_s17 = sphi %s509_s17, %s643_s17   ;;  %s469_s16 = sphi %s507_s16, %s642_s16   ;;  %s465_s15 = sphi %s505_s15, %s641_s15  }
   0x4   : > { %s530_s21 = sadd.s32 1, %s477_s18   ;;  %s119_s22 = sadd.s32 1, %s473_s17 }
   0x5   : > { %s116_s23 = ssub.s32 %s477_s18, %s530_s21  ;;  %p129_p0 = scmp.ne.s32.totalorder %s473_s17, %s469_s16 }
   0x6   : > { %p117_p1 = scmp.eq.s32.totalorder %s116_s23, 0  ;;  %p130_p2 = scmp.eq.s32.totalorder %s526_s19, 1 }
   0x7   : > { %p135_p3 = scmp.ne.s32.totalorder %s469_s16, %s465_s15  ;;  %p136_p4 = scmp.eq.s32.totalorder %s361_s20, 1 }
   0x8   : > { %s541_s24 = scalar_select %p117_p1, %s473_s17, %s119_s22  }
   0x9   : > { %p543_p5 = por %p130_p2, %p129_p0  ;;  %p547_p6 = por %p136_p4, %p135_p3 }
   0xa   : > { %p364_p7 = scmp.ge.s32.totalorder %s477_s18, 1  ;;  %p167_p8 = scmp.lt.s32.totalorder %s477_s18, 3 }
   0xc   : > { %p168_p9 = pnand %p364_p7, %p167_p8 }
   0xd   : > { %p196_p10 = scmp.lt.s32.totalorder (!%p168_p9), %s526_s19, 1  ;;  %vm205_vm0 = vcmask (!%p168_p9), 31744   ;;  %s193_s6 = sand.u32 (!%p168_p9), 1, %s469_s16   ;;  %vm253_vm3 = vcmask (!%p168_p9), 1040384   ;;  %vm255_vm4 = vcmask (!%p168_p9), 25600   ;;  %v240_v26 = vlaneseq (!%p168_p9) }
   0xe   : > { %171 = sbr.rel (%p168_p9) target bundleno = 103 (0x67), region = 32  ;;  %s365_s7 = sshll.u32 (!%p168_p9), %s193_s6, 1 }
   0xf   : > { %s195_s8 = scalar_lea.vmem (!%p168_p9), [#allocation2], %s365_s7  ;;  %s369_s10 = sshll.u32 (!%p168_p9), %s526_s19, 5 }
  0x10   : > { %s278_s9 = sshll.u32 (!%p168_p9), %s195_s8, 4  ;;  %s579_s13 = scalar_lea.hbm (!%p168_p9), %s638_s4, %s369_s10  ;;  %s574_s9 = int_to_ptr.vmem [resolvable:$true] %s278_s9 }
  0x11   : > { %s262_s14 = scalar_lea.sflag (!%p168_p9), [#allocation3], %s193_s6  ;;  %s479_s20 = smov (!%p168_p9), [#allocation2]  }
  0x12   : > { %s419_s22 = sshll.u32 (!%p168_p9), %s479_s20, 4  ;;  %s420_s22 = int_to_ptr.vmem [resolvable:$false] %s419_s22 }
  0x13   : > { %s421_s23 = scalar_lea.vmem (!%p168_p9), %s420_s22, 64  ;;  %p422_p0 = scmp.lt.s32.totalorder (!%p168_p9), %s574_s9, %s420_s22 }
  0x15   : > { %s555_s27 = scalar_select %p196_p10, %s526_s19, 1 }
  0x16   : > { %s415_s19 = scalar_lea.vmem %s574_s9, 32 }
  0x17   : > { %s366_s28 = sshll.u32 %s555_s27, 3  ;;  %p416_p11 = scmp.ne.s32.totalorder %s574_s9, %s415_s19 }
  0x18   : > { %s199_s5 = scalar_lea.vmem %s634_s0, %s366_s28  ;;  %p423_p1 = scmp.lt.s32.totalorder %s421_s23, %s415_s19 }
  0x19   : > { %v563_v0 = vld [vmem:[%s199_s5] sm:$0xff]  ;;  %p417_p12 = pnand %p416_p11, %p543_p5 }
  0x1a   : > { %v206_v1 = vsel %vm205_vm0, %v563_v0, 0.0  ;;  %p424_p2 = por %p423_p1, %p422_p0 }
  0x1b   : > { %v207_v2 = vrot.slane %v206_v1, 4  ;;  %p418_p13 = pneg %p417_p12 }
  0x1d   : > { %v208_v3 = vadd.f32 %v207_v2, %v206_v1  ;;  %p425_p3 = pnand %p424_p2, %p418_p13 }
  0x1f   : > { %v209_v4 = vrot.slane %v208_v3, 2 }
  0x21   : > { %v210_v5 = vadd.f32 %v209_v4, %v208_v3 }
  0x23   : > { %v211_v6 = vrot.slane %v210_v5, 1 }
  0x25   : > { %v212_v7 = vadd.f32 %v211_v6, %v210_v5 }
  0x27   : > { %v567_v8 = vmul.f32 0.125, %v212_v7 }
  0x29   : > { %v215_v9 = vsub.f32 %v563_v0, %v567_v8 }
  0x2b   : > { %v216_v10 = vmul.f32 %v215_v9, %v215_v9 }
  0x2d   : > { %v217_v11 = vsel %vm205_vm0, %v216_v10, 0.0 }
  0x2e   : > { %v218_v12 = vrot.slane %v217_v11, 4 }
  0x30   : > { %v219_v13 = vadd.f32 %v218_v12, %v217_v11 }
  0x32   : > { %v220_v14 = vrot.slane %v219_v13, 2 }
  0x34   : > { %v221_v15 = vadd.f32 %v220_v14, %v219_v13 }
  0x36   : > { %v222_v16 = vrot.slane %v221_v15, 1 }
  0x38   : > { %v223_v17 = vadd.f32 %v222_v16, %v221_v15 }
  0x3a   : > { %v224_v18 = vmul.f32 0.125, %v223_v17 }
  0x3c   : > { %v225_v19 = vadd.f32 1e-05, %v224_v18 }
  0x3e   : > { %411 = vrsqrt.f32 %v225_v19  ;;  %vm228_vm1 = vcmp.eq.f32.partialorder %v225_v19, inf  ;;  %v231_v21 = vand.u32 2147483648, %v225_v19  ;;  %vm230_vm2 = vcmp.eq.f32.partialorder %v225_v19, 0.0 }
  0x48   : > { %v412_v20 = vpop.eup %411 }
  0x49   : > { %v227_v22 = vmul.f32 %v412_v20, %v225_v19 }
  0x4b   : > { %v229_v23 = vsel %vm228_vm1, %v225_v19, %v227_v22 }
  0x4c   : > { %v232_v24 = vsel %vm230_vm2, %v231_v21, %v229_v23 }
  0x4d   : > { %413 = vrcp.f32 %v232_v24  ;;  %v254_v25 = vsel %vm253_vm3, %v567_v8, %v232_v24 }
  0x4e   : > { %256 = vst.msk [vmem:[%s195_s8] sm:$0x3] %vm255_vm4, %v254_v25 }
  0x4f   : > { %428 = shalt.err (!%p425_p3)
}
  0x50   : > { %s429_s29 = scalar_lea.hbm %s579_s13, 32  ;;  %s433_s6 = scalar_lea.hbm %s638_s4, 64 }
  0x51   : > { %p430_p4 = scmp.ne.s32.totalorder %s579_s13, %s429_s29  ;;  %p434_p9 = scmp.lt.u32.totalorder %s579_s13, %s638_s4 }
  0x52   : > { %p435_p10 = scmp.lt.u32.totalorder %s433_s6, %s429_s29  ;;  %p437_p12 = scmp.lt.u32.totalorder %s429_s29, %s579_s13 }
  0x53   : > { %p431_p7 = pnand %p430_p4, %p543_p5 }
  0x54   : > { %p436_p11 = por %p435_p10, %p434_p9 }
  0x55   : > { %p432_p8 = pneg %p431_p7 }
  0x56   : > { %p438_p13 = por %p437_p12, %p436_p11 }
  0x58   : > { %p439_p0 = pnand %p438_p13, %p432_p8 }
  0x5a   : > { %442 = shalt.err (!%p439_p0)
}
  0x5b   : > { %372 = dma.vmem_to_hbm [thread:$0]  (%p543_p5), %s574_s9, 32, %s579_s13, %s262_s14   ;;  %v241_v27 = vshrl.u32 %v240_v26, 7  ;;  %v235_v28 = vld [vmem:[%s635_s1] sm:$0x1]  ;;  %v414_v30 = vpop.eup %413 }
  0x5c   : > { %v237_v31 = vmul.f32 %v414_v30, %v235_v28  ;;  %v236_v32 = vld [vmem:[%s636_s2] sm:$0x1]  ;;  %s203_s13 = scalar_lea.vmem %s637_s3, %s366_s28 }
  0x5d   : > { %v242_v29 = vsub.s32 0, %v241_v27 }
  0x5e   : > { %v238_v33 = vmul.f32 %v237_v31, %v567_v8 }
  0x5f   : > { %v243_v34 = vrot.slane %v237_v31, %v242_v29 }
  0x60   : > { %v239_v35 = vsub.f32 %v236_v32, %v238_v33 }
  0x61   : > { %v244_v36 = vmul.f32 %v243_v34, %v563_v0 }
  0x62   : > { %v249_v37 = vrot.slane %v239_v35, %v242_v29 }
  0x64   : > { %v251_v38 = vadd.f32 %v249_v37, %v244_v36 }
  0x66   : > { %252 = vst.msk [vmem:[%s203_s13] sm:$0xff] %vm205_vm0, %v251_v38 }
  0x67 PF: > { %p378_p5 = scmp.ge.s32.totalorder %s477_s18, 2  ;;  %s297_s14 = sand.u32 1, %s465_s15  }
  0x68   : > { %s298_s20 = scalar_lea.sflag [#allocation3], %s297_s14 }
  0x69   : > { %p375_p1 = pnand %p378_p5, %p547_p6 }
  0x6b   : > { %460 = dma.done.wait (!%p375_p1), %s298_s20, 32  }
  0x6c   : > { %462 = vsyncadd (!%p375_p1), %s298_s20, 4294967264  ;;  %p15_p2 = scmp.ge.s32.totalorder %s530_s21, 4   ;;  %s641_s15 = smov %s469_s16 }
  0x6d   : > { %s642_s16 = smov %s473_s17  ;;  %s643_s17 = smov %s541_s24 }
  0x6e   : > { %s644_s18 = smov %s530_s21  ;;  %17 = sbr.rel (!%p15_p2) target bundleno = 3 (0x3), region = 79 }
  0x75   :  { %303 = vsyncpa [#allocation3], 1 }
  0x76   :  { %305 = vsyncpa [#allocation3 + $0x1], 1 }

</bundles_post_ra>
